<compile_context>
chip_gen: v5e
topology: v5e:2x2
jax: 0.10.0
libtpu: 0.0.40
codegen_flags: <defaults>
</compile_context>

<pallas_src>
import functools

import jax
import jax.numpy as jnp
from jax.experimental import pallas as pl
from jax.experimental.pallas import tpu as pltpu


# ---------------------------------------------------------------------------
# Helpers
# ---------------------------------------------------------------------------
@functools.lru_cache(maxsize=1)
def _vmem_limit_bytes():
    """Generation-aware scoped-VMEM budget (leave ~15% for Mosaic internals)."""
    try:
        cap = int(pltpu.get_tpu_info().vmem_capacity_bytes)
    except Exception:
        cap = 64 * 1024 * 1024  # conservative (v7x-sized) fallback
    return max(32 * 1024 * 1024, int(cap * 0.85))


def _buffered_spec(block_shape, index_map, depth=3):
    """Adjacency-panel BlockSpec with deeper pipelining where supported."""
    try:
        return pl.BlockSpec(block_shape, index_map, pipeline_mode=pl.Buffered(depth))
    except (TypeError, AttributeError):
        return pl.BlockSpec(block_shape, index_map)


def _pick_tile(n, candidates, prefer_split=False):
    divs = [c for c in candidates if n % c == 0]
    if prefer_split:
        split = [c for c in divs if n // c >= 2]
        if split:
            return split[0]
    return divs[0] if divs else n


def _dot_adj(h, adj, symmetric_adj):
    """(norm_adj @ ego).T in the transposed (D, N) layout, f32 accumulation.

    symmetric_adj=True : ego.T @ adj        (exact because adj == adj.T)
    symmetric_adj=False: ego.T @ adj.T via dot_general contracting dims
                         (exact for ANY adjacency; transpose folded into matmul)
    """
    if symmetric_adj:
        return jnp.dot(h, adj, preferred_element_type=jnp.float32)
    return jax.lax.dot_general(
        h, adj,
        dimension_numbers=(((1,), (1,)), ((), ())),
        preferred_element_type=jnp.float32,
    )


# ---------------------------------------------------------------------------
# Kernels
# ---------------------------------------------------------------------------
def _resident_kernel(ego_ref, adj_ref, out_ref, acc_ref, h_ref, *,
                     n_layers, inv_count, symmetric_adj):
    """All-VMEM-resident path.  ego_ref: (D, N) f32; adj_ref: (N, N) bf16.

    Computes mean_{k=0..n_layers} (norm_adj^k @ ego) in transposed layout.
    acc_ref (f32) and h_ref (bf16) are VMEM scratch so vreg pressure stays
    bounded regardless of N (no spill/refill churn across the unrolled loop).
    """
    acc_ref[...] = ego_ref[...]                          # layer-0 term, exact f32
    h_ref[...] = ego_ref[...].astype(h_ref.dtype)        # bf16 operand for layer 1
    for layer in range(n_layers):                        # static -> fully unrolled
        h = _dot_adj(h_ref[...], adj_ref[...], symmetric_adj)   # f32 out
        acc_ref[...] += h
        if layer + 1 < n_layers:
            h_ref[...] = h.astype(h_ref.dtype)
    out_ref[...] = (acc_ref[...] * inv_count).astype(out_ref.dtype)


def _streamed_layer_kernel(ego_ref, adj_ref, out_ref, acc_ref, *, symmetric_adj):
    """One propagation layer, adjacency streamed from HBM in panels.

    Grid = (output column panels ["parallel"], contraction panels ["arbitrary"]).
    ego_ref: (D, tk) bf16; adj_ref: bf16 panel; acc_ref: (D, tn) f32 scratch.
    """
    k = pl.program_id(1)

    @pl.when(k == 0)
    def _init():
        acc_ref[...] = jnp.zeros_like(acc_ref)

    acc_ref[...] += _dot_adj(ego_ref[...], adj_ref[...], symmetric_adj)

    @pl.when(k == pl.num_programs(1) - 1)
    def _finalize():
        out_ref[...] = acc_ref[...].astype(out_ref.dtype)


# ---------------------------------------------------------------------------
# Wrappers
# ---------------------------------------------------------------------------
def _resident_forward(adj_bf16, ego_t_f32, n_layers, symmetric_adj, vmem_limit):
    D, N = ego_t_f32.shape
    kernel = functools.partial(
        _resident_kernel,
        n_layers=n_layers,
        inv_count=1.0 / float(n_layers + 1),
        symmetric_adj=symmetric_adj,
    )
    return pl.pallas_call(
        kernel,
        out_shape=jax.ShapeDtypeStruct((D, N), jnp.float32),
        in_specs=[
            pl.BlockSpec(memory_space=pltpu.MemorySpace.VMEM),  # ego_t (f32, tiny)
            pl.BlockSpec(memory_space=pltpu.MemorySpace.VMEM),  # adj (bf16, resident)
        ],
        out_specs=pl.BlockSpec(memory_space=pltpu.MemorySpace.VMEM),
        scratch_shapes=[
            pltpu.VMEM((D, N), jnp.float32),    # running layer sum
            pltpu.VMEM((D, N), jnp.bfloat16),   # bf16 layer state (dot LHS)
        ],
        compiler_params=pltpu.CompilerParams(vmem_limit_bytes=vmem_limit),
    )(ego_t_f32, adj_bf16)


def _streamed_forward(adj_bf16, ego_t_f32, n_layers, symmetric_adj, vmem_limit):
    D, N = ego_t_f32.shape
    # Pad N to a lane multiple so every block is full (no partial edge blocks).
    Np = ((N + 127) // 128) * 128
    if Np != N:
        adj_bf16 = jnp.pad(adj_bf16, ((0, Np - N), (0, Np - N)))
        ego_t_f32 = jnp.pad(ego_t_f32, ((0, 0), (0, Np - N)))

    tn = _pick_tile(Np, (512, 256, 128), prefer_split=True)   # >=2 panels -> 2 TCs on v7x
    tk = _pick_tile(Np, (1024, 512, 256, 128))                 # large tk amortizes MXU pushes

    if symmetric_adj:
        adj_block, adj_map = (tk, tn), (lambda i, k: (k, i))
    else:
        adj_block, adj_map = (tn, tk), (lambda i, k: (i, k))

    layer_call = pl.pallas_call(
        functools.partial(_streamed_layer_kernel, symmetric_adj=symmetric_adj),
        out_shape=jax.ShapeDtypeStruct((D, Np), jnp.float32),
        grid=(Np // tn, Np // tk),
        in_specs=[
            pl.BlockSpec((D, tk), lambda i, k: (0, k)),        # bf16 layer state
            _buffered_spec(adj_block, adj_map, depth=3),       # streamed adjacency
        ],
        out_specs=pl.BlockSpec((D, tn), lambda i, k: (0, i)),
        scratch_shapes=[pltpu.VMEM((D, tn), jnp.float32)],
        compiler_params=pltpu.CompilerParams(
            dimension_semantics=("parallel", "arbitrary"),
            vmem_limit_bytes=vmem_limit,
        ),
    )

    inv = 1.0 / float(n_layers + 1)
    acc = ego_t_f32                                # f32 running sum (tiny, stays in XLA)
    h = ego_t_f32.astype(jnp.bfloat16)
    for _ in range(n_layers):
        h_f32 = layer_call(h, adj_bf16)
        acc = acc + h_f32
        h = h_f32.astype(jnp.bfloat16)
    out_t = acc * inv
    return out_t[:, :N] if Np != N else out_t


@functools.partial(jax.jit, static_argnames=("n_layers", "path", "symmetric_adj"))
def recdcl_forward(norm_adj, user_emb, item_emb, *, n_layers,
                   path="auto", symmetric_adj=True):
    """Returns (user_all_embeddings, item_all_embeddings).

    norm_adj should ideally already be stored in bf16 (the cast below is then a
    no-op); symmetric_adj=True is exact for RecDCL's D^-1/2 A D^-1/2 adjacency.
    """
    user_num = user_emb.shape[0]
    ego = jnp.concatenate([user_emb, item_emb], axis=0).astype(jnp.float32)  # (N, D)
    N, D = ego.shape

    if n_layers == 0:
        return ego[:user_num], ego[user_num:]

    # bf16 adjacency: halves HBM DMA bytes and VMEM residency; all matmul
    # accumulation stays f32 via preferred_element_type.
    adj_bf16 = norm_adj.astype(jnp.bfloat16)
    ego_t = jnp.transpose(ego)  # (D, N) lane-dense layout (tiny D*N transpose)

    vmem_limit = _vmem_limit_bytes()
    # bf16 adj + f32 ego/out/acc + bf16 layer-state scratch, with headroom.
    resident_need = N * N * 2 + N * D * (4 + 4 + 4 + 2)
    if path == "auto":
        path = "resident" if resident_need <= int(0.8 * vmem_limit) else "streamed"

    if path == "resident":
        out_t = _resident_forward(adj_bf16, ego_t, n_layers, symmetric_adj, vmem_limit)
    else:
        out_t = _streamed_forward(adj_bf16, ego_t, n_layers, symmetric_adj, vmem_limit)

    all_embeddings = jnp.transpose(out_t)  # (N, D)
    return all_embeddings[:user_num], all_embeddings[user_num:]


# ---------------------------------------------------------------------------
# Deterministic synthetic setup (mirrors RecDCL_Encoder.__init__ shapes).
# ---------------------------------------------------------------------------
def xavier_uniform(key, shape, dtype=jnp.float32):
    fan_out, fan_in = shape  # torch convention for a 2-D tensor
    bound = (6.0 / (fan_in + fan_out)) ** 0.5
    return jax.random.uniform(key, shape, dtype, minval=-bound, maxval=bound)


def build_norm_adj(key, user_num, item_num):
    """Dense symmetric-normalized bipartite adjacency D^{-1/2} A D^{-1/2}."""
    r = (jax.random.uniform(key, (user_num, item_num)) < 0.25).astype(jnp.float32)
    r = r.at[:, 0].set(1.0)
    r = r.at[0, :].set(1.0)
    n = user_num + item_num
    adj = jnp.zeros((n, n), jnp.float32)
    adj = adj.at[:user_num, user_num:].set(r)
    adj = adj.at[user_num:, :user_num].set(r.T)
    deg = adj.sum(axis=1)
    d_inv_sqrt = jnp.where(deg > 0, jax.lax.rsqrt(deg), 0.0)
    return adj * d_inv_sqrt[:, None] * d_inv_sqrt[None, :]


def reference_forward(norm_adj, user_emb, item_emb, n_layers):
    ego = jnp.concatenate([user_emb, item_emb], axis=0)
    embs = [ego]
    for _ in range(n_layers):
        ego = norm_adj @ ego
        embs.append(ego)
    mean = jnp.mean(jnp.stack(embs, axis=1), axis=1)
    u = user_emb.shape[0]
    return mean[:u], mean[u:]


if __name__ == "__main__":
    user_num, item_num, emb_size, n_layers = 48, 80, 32, 2

    key = jax.random.PRNGKey(0)
    k_u, k_i, k_adj = jax.random.split(key, 3)

    user_emb = xavier_uniform(k_u, (user_num, emb_size))
    item_emb = xavier_uniform(k_i, (item_num, emb_size))
    norm_adj = build_norm_adj(k_adj, user_num, item_num)   # f32, symmetric

    # Symmetry assumption for the no-transpose fast path (documented/asserted).
    assert jnp.allclose(norm_adj, norm_adj.T)

    # Store the adjacency once in bf16 — the form the kernel consumes — so no
    # per-call f32->bf16 HBM round trip happens inside the jitted wrapper.
    norm_adj_bf16 = norm_adj.astype(jnp.bfloat16)

    # TODO(synk): bt()/poly_feature()/cal_cl_loss() are training-time losses with
    # in-place target-history mutation; only forward() is implemented here.

    u_ref, i_ref = reference_forward(norm_adj, user_emb, item_emb, n_layers)

    # Resident fast path (auto-selected at this size).
    u_out, i_out = recdcl_forward(norm_adj_bf16, user_emb, item_emb, n_layers=n_layers)
    jax.block_until_ready((u_out, i_out))
    assert u_out.shape == (user_num, emb_size) and i_out.shape == (item_num, emb_size)
    # Tolerance absorbs bf16 operand rounding; accumulation is f32 so error does
    # not compound across layers.
    assert jnp.allclose(u_out, u_ref, atol=1e-2, rtol=1e-2)
    assert jnp.allclose(i_out, i_ref, atol=1e-2, rtol=1e-2)

    # Streamed/tiled path (forced here) — the code path used when the bf16
    # adjacency exceeds the generation's VMEM budget (and the 2-TC path on v7x).
    u_s, i_s = recdcl_forward(norm_adj_bf16, user_emb, item_emb,
                              n_layers=n_layers, path="streamed")
    jax.block_until_ready((u_s, i_s))
    assert jnp.allclose(u_s, u_ref, atol=1e-2, rtol=1e-2)
    assert jnp.allclose(i_s, i_ref, atol=1e-2, rtol=1e-2)

    print("KERNEL_OK")
</pallas_src>

<mosaic_0001>
module attributes {stable_mosaic.version = 11 : i64} {
  func.func @_resident_kernel(%arg0: memref<32x128xf32, #tpu.memory_space<vmem>>, %arg1: memref<128x128xbf16, #tpu.memory_space<vmem>>, %arg2: memref<32x128xf32, #tpu.memory_space<vmem>>, %arg3: memref<32x128xf32, #tpu.memory_space<vmem>>, %arg4: memref<32x128xbf16, #tpu.memory_space<vmem>>) attributes {dimension_semantics = [], scalar_prefetch = 0 : i64, scratch_operands = 2 : i64, tpu.core_type = #tpu.core_type<tc>} {
    %c0 = arith.constant 0 : index
    %c0_0 = arith.constant 0 : index
    %0 = vector.load %arg0[%c0, %c0_0] : memref<32x128xf32, #tpu.memory_space<vmem>>, vector<32x128xf32>
    %c0_1 = arith.constant 0 : index
    %c0_2 = arith.constant 0 : index
    %1 = vector.load %arg3[%c0_1, %c0_2] : memref<32x128xf32, #tpu.memory_space<vmem>>, vector<32x128xf32>
    tpu.vector_store %arg3[%c0_1, %c0_2], %0 {strides = array<i32>} : memref<32x128xf32, #tpu.memory_space<vmem>>, vector<32x128xf32>,
    %c0_3 = arith.constant 0 : index
    %c0_4 = arith.constant 0 : index
    %2 = vector.load %arg0[%c0_3, %c0_4] : memref<32x128xf32, #tpu.memory_space<vmem>>, vector<32x128xf32>
    %3 = arith.truncf %2 : vector<32x128xf32> to vector<32x128xbf16>
    %c0_5 = arith.constant 0 : index
    %c0_6 = arith.constant 0 : index
    %4 = vector.load %arg4[%c0_5, %c0_6] : memref<32x128xbf16, #tpu.memory_space<vmem>>, vector<32x128xbf16>
    tpu.vector_store %arg4[%c0_5, %c0_6], %3 {strides = array<i32>} : memref<32x128xbf16, #tpu.memory_space<vmem>>, vector<32x128xbf16>,
    %c0_7 = arith.constant 0 : index
    %c0_8 = arith.constant 0 : index
    %5 = vector.load %arg4[%c0_7, %c0_8] : memref<32x128xbf16, #tpu.memory_space<vmem>>, vector<32x128xbf16>
    %c0_9 = arith.constant 0 : index
    %c0_10 = arith.constant 0 : index
    %6 = vector.load %arg1[%c0_9, %c0_10] : memref<128x128xbf16, #tpu.memory_space<vmem>>, vector<128x128xbf16>
    %cst = arith.constant dense<0.000000e+00> : vector<32x128xf32>
    %7 = tpu.matmul %5, %6, %cst {dimension_numbers = #tpu.dot_dimension_numbers<[1], [0], [0], [1], [0, 0, 1, 1], [], []>} : vector<32x128xbf16>, vector<128x128xbf16>, vector<32x128xf32> -> vector<32x128xf32>
    %c0_11 = arith.constant 0 : index
    %c0_12 = arith.constant 0 : index
    %8 = vector.load %arg3[%c0_11, %c0_12] : memref<32x128xf32, #tpu.memory_space<vmem>>, vector<32x128xf32>
    %9 = arith.addf %8, %7 : vector<32x128xf32>
    %c0_13 = arith.constant 0 : index
    %c0_14 = arith.constant 0 : index
    %10 = vector.load %arg3[%c0_13, %c0_14] : memref<32x128xf32, #tpu.memory_space<vmem>>, vector<32x128xf32>
    tpu.vector_store %arg3[%c0_13, %c0_14], %9 {strides = array<i32>} : memref<32x128xf32, #tpu.memory_space<vmem>>, vector<32x128xf32>,
    %11 = arith.truncf %7 : vector<32x128xf32> to vector<32x128xbf16>
    %c0_15 = arith.constant 0 : index
    %c0_16 = arith.constant 0 : index
    %12 = vector.load %arg4[%c0_15, %c0_16] : memref<32x128xbf16, #tpu.memory_space<vmem>>, vector<32x128xbf16>
    tpu.vector_store %arg4[%c0_15, %c0_16], %11 {strides = array<i32>} : memref<32x128xbf16, #tpu.memory_space<vmem>>, vector<32x128xbf16>,
    %c0_17 = arith.constant 0 : index
    %c0_18 = arith.constant 0 : index
    %13 = vector.load %arg4[%c0_17, %c0_18] : memref<32x128xbf16, #tpu.memory_space<vmem>>, vector<32x128xbf16>
    %c0_19 = arith.constant 0 : index
    %c0_20 = arith.constant 0 : index
    %14 = vector.load %arg1[%c0_19, %c0_20] : memref<128x128xbf16, #tpu.memory_space<vmem>>, vector<128x128xbf16>
    %cst_21 = arith.constant dense<0.000000e+00> : vector<32x128xf32>
    %15 = tpu.matmul %13, %14, %cst_21 {dimension_numbers = #tpu.dot_dimension_numbers<[1], [0], [0], [1], [0, 0, 1, 1], [], []>} : vector<32x128xbf16>, vector<128x128xbf16>, vector<32x128xf32> -> vector<32x128xf32>
    %c0_22 = arith.constant 0 : index
    %c0_23 = arith.constant 0 : index
    %16 = vector.load %arg3[%c0_22, %c0_23] : memref<32x128xf32, #tpu.memory_space<vmem>>, vector<32x128xf32>
    %17 = arith.addf %16, %15 : vector<32x128xf32>
    %c0_24 = arith.constant 0 : index
    %c0_25 = arith.constant 0 : index
    %18 = vector.load %arg3[%c0_24, %c0_25] : memref<32x128xf32, #tpu.memory_space<vmem>>, vector<32x128xf32>
    tpu.vector_store %arg3[%c0_24, %c0_25], %17 {strides = array<i32>} : memref<32x128xf32, #tpu.memory_space<vmem>>, vector<32x128xf32>,
    %c0_26 = arith.constant 0 : index
    %c0_27 = arith.constant 0 : index
    %19 = vector.load %arg3[%c0_26, %c0_27] : memref<32x128xf32, #tpu.memory_space<vmem>>, vector<32x128xf32>
    %cst_28 = arith.constant 0.333333343 : f32
    %20 = vector.broadcast %cst_28 : f32 to vector<32x128xf32>
    %21 = arith.mulf %19, %20 : vector<32x128xf32>
    %c0_29 = arith.constant 0 : index
    %c0_30 = arith.constant 0 : index
    %22 = vector.load %arg2[%c0_29, %c0_30] : memref<32x128xf32, #tpu.memory_space<vmem>>, vector<32x128xf32>
    tpu.vector_store %arg2[%c0_29, %c0_30], %21 {strides = array<i32>} : memref<32x128xf32, #tpu.memory_space<vmem>>, vector<32x128xf32>,
    return
  }
}

</mosaic_0001>

<bundles_post_ra>
// kernel: recdcl_forward.1
= control target key start
LH: loop header
LB: loop body
LE: loop exit
PB: predicated region body
PF: predicated region fallthrough
CT: control target
= control target key end

     0   :  { %s518_s1 = inlined_call_operand.vmem [shape: bf16[128,128], index: 1, kind: input, shape index: {}]   ;;  %s519_s0 = inlined_call_operand.vmem [shape: f32[32,128], index: 0, kind: input, shape index: {}]   ;;  %s520_s2 = inlined_call_operand.vmem [shape: f32[32,128], index: 2, kind: output, shape index: {}]  }
   0x1   :  { %v366_v0 = vld [vmem:[%s518_s1 + $0x38] sm:$0xff]  ;;  %v365_v1 = vld [vmem:[%s518_s1 + $0x30] sm:$0xff]  ;;  %v439_v2 = vld [vmem:[%s519_s0] sm:$0xff] }
   0x2   :  { %111 = vmatpush.bf16.msra.mxu0 %v366_v0  ;;  %399 = vmatpush.bf16.msra.mxu2 %v366_v0  ;;  %v444_v3 = vld [vmem:[%s519_s0 + $0x8] sm:$0xff]  ;;  %v449_v4 = vld [vmem:[%s519_s0 + $0x10] sm:$0xff]  ;;  %v454_v5 = vld [vmem:[%s519_s0 + $0x18] sm:$0xff] }
   0x3   :  { %v380_v6 = vpack.c.bf16 %v444_v3, %v439_v2  ;;  %v385_v7 = vpack.c.bf16 %v454_v5, %v449_v4  ;;  %v376_v8 = vld [vmem:[%s518_s1 + $0x38] sm:$0xff]  ;;  %v364_v9 = vld [vmem:[%s518_s1 + $0x28] sm:$0xff]  ;;  %v375_v10 = vld [vmem:[%s518_s1 + $0x30] sm:$0xff] }
   0x4   :  { %230 = vmatpush.bf16.msra.mxu1 %v376_v8  ;;  %407 = vmatpush.bf16.msra.mxu3 %v376_v8  ;;  %v363_v11 = vld [vmem:[%s518_s1 + $0x20] sm:$0xff]  ;;  %v374_v12 = vld [vmem:[%s518_s1 + $0x28] sm:$0xff]  ;;  %v362_v13 = vld [vmem:[%s518_s1 + $0x18] sm:$0xff] }
   0x5   :  { %381 = vst [vmem:[#allocation3] sm:$0xff] %v380_v6   ;;  %v361_v14 = vld [vmem:[%s518_s1 + $0x10] sm:$0xff]  ;;  %v360_v15 = vld [vmem:[%s518_s1 + $0x8] sm:$0xff]  ;;  %v359_v16 = vld [vmem:[%s518_s1] sm:$0xff] }
   0x6   :  { %112 = vmatpush.bf16.msra.mxu0 %v365_v1  ;;  %400 = vmatpush.bf16.msra.mxu2 %v365_v1  ;;  %397 = vst [vmem:[#allocation3 + $0x8] sm:$0xff] %v385_v7   ;;  %v373_v19 = vld [vmem:[%s518_s1 + $0x20] sm:$0xff]  ;;  %v372_v20 = vld [vmem:[%s518_s1 + $0x18] sm:$0xff]  ;;  %v371_v21 = vld [vmem:[%s518_s1 + $0x10] sm:$0xff] }
   0x7   :  { %v370_v22 = vld [vmem:[%s518_s1 + $0x8] sm:$0xff]  ;;  %v369_v23 = vld [vmem:[%s518_s1] sm:$0xff] }
   0x8   :  { %231 = vmatpush.bf16.msra.mxu1 %v375_v10  ;;  %408 = vmatpush.bf16.msra.mxu3 %v375_v10 }
   0xa   :  { %113 = vmatpush.bf16.msra.mxu0 %v364_v9  ;;  %401 = vmatpush.bf16.msra.mxu2 %v364_v9 }
   0xc   :  { %232 = vmatpush.bf16.msra.mxu1 %v374_v12  ;;  %409 = vmatpush.bf16.msra.mxu3 %v374_v12  ;;  %v357_v17 = vld [vmem:[#allocation3] sm:$0xff] }
   0xd   :  { %v358_v18 = vld [vmem:[#allocation3 + $0x8] sm:$0xff] }
   0xe   :  { %114 = vmatpush.bf16.msra.mxu0 %v363_v11  ;;  %402 = vmatpush.bf16.msra.mxu2 %v363_v11 }
  0x10   :  { %233 = vmatpush.bf16.msra.mxu1 %v373_v19  ;;  %410 = vmatpush.bf16.msra.mxu3 %v373_v19 }
  0x12   :  { %115 = vmatpush.bf16.msra.mxu0 %v362_v13  ;;  %403 = vmatpush.bf16.msra.mxu2 %v362_v13 }
  0x14   :  { %234 = vmatpush.bf16.msra.mxu1 %v372_v20  ;;  %411 = vmatpush.bf16.msra.mxu3 %v372_v20 }
  0x16   :  { %116 = vmatpush.bf16.msra.mxu0 %v361_v14  ;;  %404 = vmatpush.bf16.msra.mxu2 %v361_v14 }
  0x18   :  { %235 = vmatpush.bf16.msra.mxu1 %v371_v21  ;;  %412 = vmatpush.bf16.msra.mxu3 %v371_v21 }
  0x1a   :  { %117 = vmatpush.bf16.msra.mxu0 %v360_v15  ;;  %405 = vmatpush.bf16.msra.mxu2 %v360_v15 }
  0x1c   :  { %236 = vmatpush.bf16.msra.mxu1 %v370_v22  ;;  %413 = vmatpush.bf16.msra.mxu3 %v370_v22 }
  0x1e   :  { %118 = vmatpush.bf16.msra.mxu0 %v359_v16  ;;  %406 = vmatpush.bf16.msra.mxu2 %v359_v16 }
  0x20   :  { %237 = vmatpush.bf16.msra.mxu1 %v369_v23  ;;  %414 = vmatpush.bf16.msra.mxu3 %v369_v23 }
  0x21   :  { %119 = vmatmul.bf16.vlgmr.msra.gmra.mxu0 %v357_v17  ;;  %124 = vmatmul.bf16.vlgmr.msra.gmra.mxu2 %v358_v18 }
  0x9e   :  { %v120_v24 = vpop.f32.mrf.mxu0 }
  0x9f   :  { %v134_v32 = vadd.f32 %v120_v24, %v439_v2 }
  0xa4   :  { %v125_v25 = vpop.f32.mrf.mxu2 }
  0xa5   :  { %v136_v39 = vadd.f32 %v125_v25, %v449_v4 }
  0xa6   :  { %v122_v26 = vpop.f32.mrf.mxu0 }
  0xa7   :  { %v390_v27 = vpack.c.bf16 %v122_v26, %v120_v24  ;;  %v135_v36 = vadd.f32 %v122_v26, %v444_v3 }
  0xa9   :  { %391 = vst [vmem:[#allocation3] sm:$0xff] %v390_v27  }
  0xac   :  { %v127_v28 = vpop.f32.mrf.mxu2 }
  0xad   :  { %v395_v29 = vpack.c.bf16 %v127_v28, %v125_v25  ;;  %v137_v44 = vadd.f32 %v127_v28, %v454_v5 }
  0xaf   :  { %398 = vst [vmem:[#allocation3 + $0x8] sm:$0xff] %v395_v29  }
  0xb0   :  { %v367_v30 = vld [vmem:[#allocation3] sm:$0xff] }
  0xb1   :  { %238 = vmatmul.bf16.vlgmr.msra.gmra.mxu1 %v367_v30 }
  0xb6   :  { %v368_v31 = vld [vmem:[#allocation3 + $0x8] sm:$0xff] }
  0xb7   :  { %243 = vmatmul.bf16.vlgmr.msra.gmra.mxu3 %v368_v31 }
 0x12e   :  { %v239_v33 = vpop.f32.mrf.mxu1 }
 0x12f   :  { %v253_v34 = vadd.f32 %v239_v33, %v134_v32 }
 0x131   :  { %v265_v35 = vmul.f32 0.33333334, %v253_v34 }
 0x133   :  { %269 = vst [vmem:[%s520_s2] sm:$0xff] %v265_v35 }
 0x136   :  { %v241_v37 = vpop.f32.mrf.mxu1 }
 0x137   :  { %v254_v38 = vadd.f32 %v241_v37, %v135_v36 }
 0x139   :  { %v266_v40 = vmul.f32 0.33333334, %v254_v38 }
 0x13a   :  { %v244_v41 = vpop.f32.mrf.mxu3 }
 0x13b   :  { %270 = vst [vmem:[%s520_s2 + $0x8] sm:$0xff] %v266_v40  ;;  %v255_v42 = vadd.f32 %v244_v41, %v136_v39 }
 0x13d   :  { %v267_v43 = vmul.f32 0.33333334, %v255_v42 }
 0x13f   :  { %271 = vst [vmem:[%s520_s2 + $0x10] sm:$0xff] %v267_v43 }
 0x142   :  { %v246_v45 = vpop.f32.mrf.mxu3 }
 0x143   :  { %v256_v46 = vadd.f32 %v246_v45, %v137_v44 }
 0x145   :  { %v268_v47 = vmul.f32 0.33333334, %v256_v46 }
 0x147   :  { %272 = vst [vmem:[%s520_s2 + $0x18] sm:$0xff] %v268_v47 }

</bundles_post_ra>
